<compile_context>
chip_gen: v6e
topology: v6e:2x2x1
jax: 0.10.0
libtpu: 0.0.40
codegen_flags: <defaults>
</compile_context>

<pallas_src>
from functools import partial

import jax
import jax.numpy as jnp
from jax.experimental import pallas as pl
from jax.experimental.pallas import tpu as pltpu

LANES = 128     # TPU vreg lane width
SUBLANES = 8    # TPU vreg sublane count (one (8,128) f32 tile == one vreg)


def _round_up(a, b):
    return -(-a // b) * b


def _volterra_kernel(k1_ref, kf_ref, main_ref, halo_ref, out_ref, *,
                     sps, n_lags1, n_lags2, rb, qn):
    """One grid step = rb*128 consecutive output symbols, processed in 8-row chunks.

    k1_ref   : SMEM (n_lags1,)                    first-order taps
    kf_ref   : SMEM (n_lags2*(n_lags2+1)//2,)     upper-tri taps of the flipped
                                                  symmetrized kernel2 (off-diag x2)
    main_ref : VMEM (sps, rb, 128)                polyphase block
               main[c, r, l] = x[((base + r)*128 + l - qn)*sps + c]
    halo_ref : VMEM (sps, 8, 128)                 first 8 rows of the *next* block
    out_ref  : VMEM (rb, 128)                     lane-dense output slab
    """
    p1, p2 = n_lags1 // 2, n_lags2 // 2
    pmax = max(p1, p2)
    n_chunks = rb // SUBLANES
    n_tri = n_lags2 * (n_lags2 + 1) // 2

    # ---- invariants: built / read once per grid step, reused by every chunk ----
    lane = jax.lax.broadcasted_iota(jnp.int32, (SUBLANES, LANES), 1)
    row = jax.lax.broadcasted_iota(jnp.int32, (SUBLANES, LANES), 0)
    row_is_first = row == 0

    # Distinct symbol-domain shifts (shared by all sps phases).
    shifts = sorted({(d - d % sps) // sps + qn for d in range(-pmax, pmax + 1)})
    lane_mask = {s: lane < (LANES - s) for s in shifts if s > 0}

    # SMEM taps, hoisted out of the chunk loop.
    k1v = [k1_ref[j] for j in range(n_lags1)]
    kfv = [kf_ref[t] for t in range(n_tri)]

    # Next block's first rows (only row 0 is ever consumed, for the last chunk).
    halo = [halo_ref[c, :, :] for c in range(sps)]

    def chunk_body(j, carry):
        row0 = pl.multiple_of(j * SUBLANES, SUBLANES)
        last = j + 1 >= n_chunks
        nxt_start = pl.multiple_of(
            jnp.where(last, rb - SUBLANES, row0 + SUBLANES), SUBLANES)

        # Per-phase current rows and the row-shifted-by-one view
        # (hi[r] = row row0+r+1: rows 1..7 of lo plus row 0 of the next tile).
        u_lo, u_hi = [], []
        for c in range(sps):
            lo = main_ref[c, pl.ds(row0, SUBLANES), :]
            nxt = jnp.where(last, halo[c],
                            main_ref[c, pl.ds(nxt_start, SUBLANES), :])
            hi = pltpu.roll(jnp.where(row_is_first, nxt, lo),
                            shift=SUBLANES - 1, axis=0)
            u_lo.append(lo)
            u_hi.append(hi)

        # Lag-shifted views: v[d][r, l] = x[((base + row0 + r)*128 + l)*sps + d],
        # built with lane rolls (XLU) + a lane select (VPU).
        v = {}
        for d in range(-pmax, pmax + 1):
            c = d % sps                       # polyphase component (Python int)
            s = (d - c) // sps + qn           # symbol-domain shift, 0..qn+qp
            if s == 0:
                v[d] = u_lo[c]
            else:
                rot = (LANES - s) % LANES
                v[d] = jnp.where(lane_mask[s],
                                 pltpu.roll(u_lo[c], shift=rot, axis=1),
                                 pltpu.roll(u_hi[c], shift=rot, axis=1))

        # First-order term: scalar-broadcast FMAs (VPU only).
        acc1 = k1v[0] * v[-p1]
        for jj in range(1, n_lags1):
            acc1 = acc1 + k1v[jj] * v[jj - p1]

        # Second-order term, triangular:
        #   sum_a v[a-p2] * sum_{b>=a} kf'[a,b] * v[b-p2]
        # (kf' already folds the lag flip, the K2+K2^T symmetrization and the
        #  exact 2x on the off-diagonal).
        t = 0
        acc2 = None
        for a in range(n_lags2):
            w = kfv[t] * v[a - p2]
            t += 1
            for b in range(a + 1, n_lags2):
                w = w + kfv[t] * v[b - p2]
                t += 1
            term = v[a - p2] * w
            acc2 = term if acc2 is None else acc2 + term

        out_ref[pl.ds(row0, SUBLANES), :] = acc1 + acc2
        return carry

    jax.lax.fori_loop(0, n_chunks, chunk_body, 0)


@partial(jax.jit, static_argnums=(3,), static_argnames=("block_rows",))
def second_order_volterra(x, kernel1, kernel2, sps, *, block_rows=256):
    """Forward pass of SecondOrderVolterraSeries (float32 on TPU)."""
    n_lags1 = int(kernel1.shape[0])
    n_lags2 = int(kernel2.shape[0])
    sps = int(sps)
    assert n_lags1 % 2 == 1 and n_lags2 % 2 == 1
    assert sps >= 1
    p1, p2 = n_lags1 // 2, n_lags2 // 2
    pmax = max(p1, p2)
    n = int(x.shape[0])
    m = (n - 1) // sps + 1

    # Symbol-domain halo: extra symbols needed before / after each 128-lane row.
    qn = -((-pmax) // sps)                       # ceil(pmax / sps)
    qp = pmax // sps
    assert qn + qp <= LANES, "lag span too large for the single-row halo scheme"

    rows_needed = pl.cdiv(m, LANES)              # total 128-symbol output rows
    # Keep the grid >= 2 steps where possible so ("parallel",) can shard the
    # steps across both v7x TensorCores; on v5e/v6e (1 TC) this cap only
    # affects medium-sized inputs and costs nothing.
    rb_cap = max(SUBLANES, _round_up(pl.cdiv(rows_needed, 2), SUBLANES))
    rb = max(SUBLANES, min(_round_up(block_rows, SUBLANES), rb_cap))
    g = pl.cdiv(rows_needed, rb)                 # grid steps
    rows_total = g * rb + SUBLANES               # + 8 halo rows at the end
    total_sym = rows_total * LANES               # padded symbols per phase

    x = x.astype(jnp.float32)
    k1 = kernel1.astype(jnp.float32)

    ksym = (kernel2 + kernel2.T).astype(jnp.float32)
    kf = ksym[::-1, ::-1]                        # fold torch.flip of the lag axis
    # Symmetric -> keep the upper triangle only, fold the exact factor 2 into
    # the off-diagonal taps, flatten row-major for 1-D SMEM.
    kf_tri = (kf * (2.0 - jnp.eye(n_lags2, dtype=jnp.float32)))[
        jnp.triu_indices(n_lags2)]

    # ---- polyphase decomposition: one pad + one transpose, no per-block
    # strips and no halo duplication in HBM ----
    #   poly[c, r, l] = x[((r*128 + l) - qn)*sps + c]   (zero outside x)
    xp = jnp.pad(x, (qn * sps, total_sym * sps - n - qn * sps))
    poly = xp.reshape(total_sym, sps).T.reshape(sps, rows_total, LANES)

    kernel = partial(_volterra_kernel, sps=sps, n_lags1=n_lags1,
                     n_lags2=n_lags2, rb=rb, qn=qn)

    cost = pl.CostEstimate(
        flops=int(m) * (2 * n_lags1 + n_lags2 * (n_lags2 + 3)),
        transcendentals=0,
        bytes_accessed=4 * (sps * rows_total * LANES + g * rb * LANES + n),
    )

    out = pl.pallas_call(
        kernel,
        out_shape=jax.ShapeDtypeStruct((g * rb, LANES), jnp.float32),
        grid_spec=pltpu.PrefetchScalarGridSpec(
            num_scalar_prefetch=2,               # k1, kf_tri -> SMEM scalar tables
            grid=(g,),
            in_specs=[
                # main block: rows [i*rb, (i+1)*rb)
                pl.BlockSpec((sps, rb, LANES),
                             lambda i, k1s, kfs: (0, i, 0)),
                # overlapping 8-row halo: rows [(i+1)*rb, (i+1)*rb + 8)
                pl.BlockSpec((sps, SUBLANES, LANES),
                             lambda i, k1s, kfs: (0, (i + 1) * (rb // SUBLANES), 0)),
            ],
            out_specs=pl.BlockSpec((rb, LANES), lambda i, k1s, kfs: (i, 0)),
        ),
        compiler_params=pltpu.CompilerParams(
            dimension_semantics=("parallel",)),
        cost_estimate=cost,
    )(k1, kf_tri, poly, poly)

    return out.reshape(-1)[:m]


def _reference(x, kernel1, kernel2, sps):
    """Pure-JAX mirror of the torch forward (float32)."""
    n_lags1 = kernel1.shape[0]
    n_lags2 = kernel2.shape[0]
    p1, p2 = n_lags1 // 2, n_lags2 // 2
    n = x.shape[0]
    m = (n - 1) // sps + 1
    x = x.astype(jnp.float32)

    x1pad = jnp.concatenate(
        [jnp.zeros((p1,), jnp.float32), x, jnp.zeros((p1,), jnp.float32)])
    idx1 = jnp.arange(m)[:, None] * sps + jnp.arange(n_lags1)[None, :]
    y = jnp.matmul(x1pad[idx1], kernel1.astype(jnp.float32),
                   precision=jax.lax.Precision.HIGHEST)

    x2pad = jnp.concatenate(
        [jnp.zeros((p2,), jnp.float32), x, jnp.zeros((p2,), jnp.float32)])
    idx2 = (jnp.arange(m)[:, None] * sps
            + (n_lags2 - 1 - jnp.arange(n_lags2))[None, :])     # flipped lags
    xlag = x2pad[idx2]
    ksym = (kernel2 + kernel2.T).astype(jnp.float32)
    y2 = jnp.einsum('ij,jk,ik->i', xlag, ksym, xlag,
                    precision=jax.lax.Precision.HIGHEST)
    return y + y2


if __name__ == "__main__":
    # (n_lags1, n_lags2, samples_per_symbol, signal length)
    configs = [
        (15, 9, 2, 256),      # original demo config (M = 128, single grid step)
        (7, 11, 3, 5000),     # p2 > p1, sps = 3, 2-step grid with padded tail
        (5, 5, 1, 2048),      # sps = 1, halo rows carry real signal data
        (9, 7, 2, 40000),     # multi-chunk blocks (rb = 80, 10 chunks) x 2 steps
    ]
    key = jax.random.PRNGKey(0)
    for (n_lags1, n_lags2, sps, n) in configs:
        key, kx, k1k, k2k = jax.random.split(key, 4)
        x = jax.random.normal(kx, (n,), dtype=jnp.float32)

        # Module default init (delta / zeros) plus a small deterministic
        # perturbation so both terms are exercised.
        kernel1 = jnp.zeros((n_lags1,), jnp.float32).at[n_lags1 // 2].set(1.0)
        kernel1 = kernel1 + 0.05 * jax.random.normal(k1k, (n_lags1,), jnp.float32)
        kernel2 = 0.05 * jax.random.normal(k2k, (n_lags2, n_lags2), jnp.float32)

        out = jax.block_until_ready(
            second_order_volterra(x, kernel1, kernel2, sps))
        ref = jax.block_until_ready(_reference(x, kernel1, kernel2, sps))

        m = (n - 1) // sps + 1
        assert out.shape == ref.shape == (m,)
        max_err = float(jnp.max(jnp.abs(out - ref)))
        assert jnp.allclose(out, ref, rtol=1e-4, atol=1e-4), (
            f"config {(n_lags1, n_lags2, sps, n)}: max abs err = {max_err}")
    print("KERNEL_OK")
</pallas_src>

<mosaic_0001>
module attributes {stable_mosaic.version = 11 : i64} {
  func.func @_volterra_kernel(%arg0: i32, %arg1: memref<15xf32, #tpu.memory_space<smem>>, %arg2: memref<45xf32, #tpu.memory_space<smem>>, %arg3: memref<2x8x128xf32, #tpu.memory_space<vmem>>, %arg4: memref<2x8x128xf32, #tpu.memory_space<vmem>>, %arg5: memref<8x128xf32, #tpu.memory_space<vmem>>) attributes {dimension_semantics = [#tpu.dimension_semantics<parallel>], iteration_bounds = array<i64: 1>, scalar_prefetch = 2 : i64, scratch_operands = 0 : i64, tpu.core_type = #tpu.core_type<tc>, window_params = [{transform_indices = @transform_0, window_bounds = array<i64: 2, 8, 128>}, {transform_indices = @transform_1, window_bounds = array<i64: 2, 8, 128>}, {transform_indices = @transform_2, window_bounds = array<i64: 8, 128>}]} {
    %0 = tpu.iota {dimensions = array<i32: 1>} : vector<8x128xi32>
    %1 = tpu.iota {dimensions = array<i32: 0>} : vector<8x128xi32>
    %c0_i32 = arith.constant 0 : i32
    %2 = vector.broadcast %c0_i32 : i32 to vector<8x128xi32>
    %3 = arith.cmpi eq, %1, %2 : vector<8x128xi32>
    %c127_i32 = arith.constant 127 : i32
    %4 = vector.broadcast %c127_i32 : i32 to vector<8x128xi32>
    %5 = arith.cmpi slt, %0, %4 : vector<8x128xi32>
    %c126_i32 = arith.constant 126 : i32
    %6 = vector.broadcast %c126_i32 : i32 to vector<8x128xi32>
    %7 = arith.cmpi slt, %0, %6 : vector<8x128xi32>
    %c125_i32 = arith.constant 125 : i32
    %8 = vector.broadcast %c125_i32 : i32 to vector<8x128xi32>
    %9 = arith.cmpi slt, %0, %8 : vector<8x128xi32>
    %c124_i32 = arith.constant 124 : i32
    %10 = vector.broadcast %c124_i32 : i32 to vector<8x128xi32>
    %11 = arith.cmpi slt, %0, %10 : vector<8x128xi32>
    %c123_i32 = arith.constant 123 : i32
    %12 = vector.broadcast %c123_i32 : i32 to vector<8x128xi32>
    %13 = arith.cmpi slt, %0, %12 : vector<8x128xi32>
    %c122_i32 = arith.constant 122 : i32
    %14 = vector.broadcast %c122_i32 : i32 to vector<8x128xi32>
    %15 = arith.cmpi slt, %0, %14 : vector<8x128xi32>
    %c121_i32 = arith.constant 121 : i32
    %16 = vector.broadcast %c121_i32 : i32 to vector<8x128xi32>
    %17 = arith.cmpi slt, %0, %16 : vector<8x128xi32>
    %c0 = arith.constant 0 : index
    %18 = memref.load %arg1[%c0] : memref<15xf32, #tpu.memory_space<smem>>
    %c1 = arith.constant 1 : index
    %19 = memref.load %arg1[%c1] : memref<15xf32, #tpu.memory_space<smem>>
    %c2 = arith.constant 2 : index
    %20 = memref.load %arg1[%c2] : memref<15xf32, #tpu.memory_space<smem>>
    %c3 = arith.constant 3 : index
    %21 = memref.load %arg1[%c3] : memref<15xf32, #tpu.memory_space<smem>>
    %c4 = arith.constant 4 : index
    %22 = memref.load %arg1[%c4] : memref<15xf32, #tpu.memory_space<smem>>
    %c5 = arith.constant 5 : index
    %23 = memref.load %arg1[%c5] : memref<15xf32, #tpu.memory_space<smem>>
    %c6 = arith.constant 6 : index
    %24 = memref.load %arg1[%c6] : memref<15xf32, #tpu.memory_space<smem>>
    %c7 = arith.constant 7 : index
    %25 = memref.load %arg1[%c7] : memref<15xf32, #tpu.memory_space<smem>>
    %c8 = arith.constant 8 : index
    %26 = memref.load %arg1[%c8] : memref<15xf32, #tpu.memory_space<smem>>
    %c9 = arith.constant 9 : index
    %27 = memref.load %arg1[%c9] : memref<15xf32, #tpu.memory_space<smem>>
    %c10 = arith.constant 10 : index
    %28 = memref.load %arg1[%c10] : memref<15xf32, #tpu.memory_space<smem>>
    %c11 = arith.constant 11 : index
    %29 = memref.load %arg1[%c11] : memref<15xf32, #tpu.memory_space<smem>>
    %c12 = arith.constant 12 : index
    %30 = memref.load %arg1[%c12] : memref<15xf32, #tpu.memory_space<smem>>
    %c13 = arith.constant 13 : index
    %31 = memref.load %arg1[%c13] : memref<15xf32, #tpu.memory_space<smem>>
    %c14 = arith.constant 14 : index
    %32 = memref.load %arg1[%c14] : memref<15xf32, #tpu.memory_space<smem>>
    %c0_0 = arith.constant 0 : index
    %33 = memref.load %arg2[%c0_0] : memref<45xf32, #tpu.memory_space<smem>>
    %c1_1 = arith.constant 1 : index
    %34 = memref.load %arg2[%c1_1] : memref<45xf32, #tpu.memory_space<smem>>
    %c2_2 = arith.constant 2 : index
    %35 = memref.load %arg2[%c2_2] : memref<45xf32, #tpu.memory_space<smem>>
    %c3_3 = arith.constant 3 : index
    %36 = memref.load %arg2[%c3_3] : memref<45xf32, #tpu.memory_space<smem>>
    %c4_4 = arith.constant 4 : index
    %37 = memref.load %arg2[%c4_4] : memref<45xf32, #tpu.memory_space<smem>>
    %c5_5 = arith.constant 5 : index
    %38 = memref.load %arg2[%c5_5] : memref<45xf32, #tpu.memory_space<smem>>
    %c6_6 = arith.constant 6 : index
    %39 = memref.load %arg2[%c6_6] : memref<45xf32, #tpu.memory_space<smem>>
    %c7_7 = arith.constant 7 : index
    %40 = memref.load %arg2[%c7_7] : memref<45xf32, #tpu.memory_space<smem>>
    %c8_8 = arith.constant 8 : index
    %41 = memref.load %arg2[%c8_8] : memref<45xf32, #tpu.memory_space<smem>>
    %c9_9 = arith.constant 9 : index
    %42 = memref.load %arg2[%c9_9] : memref<45xf32, #tpu.memory_space<smem>>
    %c10_10 = arith.constant 10 : index
    %43 = memref.load %arg2[%c10_10] : memref<45xf32, #tpu.memory_space<smem>>
    %c11_11 = arith.constant 11 : index
    %44 = memref.load %arg2[%c11_11] : memref<45xf32, #tpu.memory_space<smem>>
    %c12_12 = arith.constant 12 : index
    %45 = memref.load %arg2[%c12_12] : memref<45xf32, #tpu.memory_space<smem>>
    %c13_13 = arith.constant 13 : index
    %46 = memref.load %arg2[%c13_13] : memref<45xf32, #tpu.memory_space<smem>>
    %c14_14 = arith.constant 14 : index
    %47 = memref.load %arg2[%c14_14] : memref<45xf32, #tpu.memory_space<smem>>
    %c15 = arith.constant 15 : index
    %48 = memref.load %arg2[%c15] : memref<45xf32, #tpu.memory_space<smem>>
    %c16 = arith.constant 16 : index
    %49 = memref.load %arg2[%c16] : memref<45xf32, #tpu.memory_space<smem>>
    %c17 = arith.constant 17 : index
    %50 = memref.load %arg2[%c17] : memref<45xf32, #tpu.memory_space<smem>>
    %c18 = arith.constant 18 : index
    %51 = memref.load %arg2[%c18] : memref<45xf32, #tpu.memory_space<smem>>
    %c19 = arith.constant 19 : index
    %52 = memref.load %arg2[%c19] : memref<45xf32, #tpu.memory_space<smem>>
    %c20 = arith.constant 20 : index
    %53 = memref.load %arg2[%c20] : memref<45xf32, #tpu.memory_space<smem>>
    %c21 = arith.constant 21 : index
    %54 = memref.load %arg2[%c21] : memref<45xf32, #tpu.memory_space<smem>>
    %c22 = arith.constant 22 : index
    %55 = memref.load %arg2[%c22] : memref<45xf32, #tpu.memory_space<smem>>
    %c23 = arith.constant 23 : index
    %56 = memref.load %arg2[%c23] : memref<45xf32, #tpu.memory_space<smem>>
    %c24 = arith.constant 24 : index
    %57 = memref.load %arg2[%c24] : memref<45xf32, #tpu.memory_space<smem>>
    %c25 = arith.constant 25 : index
    %58 = memref.load %arg2[%c25] : memref<45xf32, #tpu.memory_space<smem>>
    %c26 = arith.constant 26 : index
    %59 = memref.load %arg2[%c26] : memref<45xf32, #tpu.memory_space<smem>>
    %c27 = arith.constant 27 : index
    %60 = memref.load %arg2[%c27] : memref<45xf32, #tpu.memory_space<smem>>
    %c28 = arith.constant 28 : index
    %61 = memref.load %arg2[%c28] : memref<45xf32, #tpu.memory_space<smem>>
    %c29 = arith.constant 29 : index
    %62 = memref.load %arg2[%c29] : memref<45xf32, #tpu.memory_space<smem>>
    %c30 = arith.constant 30 : index
    %63 = memref.load %arg2[%c30] : memref<45xf32, #tpu.memory_space<smem>>
    %c31 = arith.constant 31 : index
    %64 = memref.load %arg2[%c31] : memref<45xf32, #tpu.memory_space<smem>>
    %c32 = arith.constant 32 : index
    %65 = memref.load %arg2[%c32] : memref<45xf32, #tpu.memory_space<smem>>
    %c33 = arith.constant 33 : index
    %66 = memref.load %arg2[%c33] : memref<45xf32, #tpu.memory_space<smem>>
    %c34 = arith.constant 34 : index
    %67 = memref.load %arg2[%c34] : memref<45xf32, #tpu.memory_space<smem>>
    %c35 = arith.constant 35 : index
    %68 = memref.load %arg2[%c35] : memref<45xf32, #tpu.memory_space<smem>>
    %c36 = arith.constant 36 : index
    %69 = memref.load %arg2[%c36] : memref<45xf32, #tpu.memory_space<smem>>
    %c37 = arith.constant 37 : index
    %70 = memref.load %arg2[%c37] : memref<45xf32, #tpu.memory_space<smem>>
    %c38 = arith.constant 38 : index
    %71 = memref.load %arg2[%c38] : memref<45xf32, #tpu.memory_space<smem>>
    %c39 = arith.constant 39 : index
    %72 = memref.load %arg2[%c39] : memref<45xf32, #tpu.memory_space<smem>>
    %c40 = arith.constant 40 : index
    %73 = memref.load %arg2[%c40] : memref<45xf32, #tpu.memory_space<smem>>
    %c41 = arith.constant 41 : index
    %74 = memref.load %arg2[%c41] : memref<45xf32, #tpu.memory_space<smem>>
    %c42 = arith.constant 42 : index
    %75 = memref.load %arg2[%c42] : memref<45xf32, #tpu.memory_space<smem>>
    %c43 = arith.constant 43 : index
    %76 = memref.load %arg2[%c43] : memref<45xf32, #tpu.memory_space<smem>>
    %c44 = arith.constant 44 : index
    %77 = memref.load %arg2[%c44] : memref<45xf32, #tpu.memory_space<smem>>
    %c0_15 = arith.constant 0 : index
    %c0_16 = arith.constant 0 : index
    %c0_17 = arith.constant 0 : index
    %78 = vector.load %arg4[%c0_15, %c0_16, %c0_17] : memref<2x8x128xf32, #tpu.memory_space<vmem>>, vector<1x8x128xf32>
    %79 = vector.shape_cast %78 : vector<1x8x128xf32> to vector<8x128xf32>
    %c1_18 = arith.constant 1 : index
    %c0_19 = arith.constant 0 : index
    %c0_20 = arith.constant 0 : index
    %80 = vector.load %arg4[%c1_18, %c0_19, %c0_20] : memref<2x8x128xf32, #tpu.memory_space<vmem>>, vector<1x8x128xf32>
    %81 = vector.shape_cast %80 : vector<1x8x128xf32> to vector<8x128xf32>
    %c0_i32_21 = arith.constant 0 : i32
    %c8_i32 = arith.constant 8 : i32
    %82 = arith.muli %c0_i32_21, %c8_i32 : i32
    %83 = tpu.assume_multiple %82, 8 : i32
    %c1_i32 = arith.constant 1 : i32
    %84 = arith.addi %c0_i32_21, %c1_i32 : i32
    %c1_i32_22 = arith.constant 1 : i32
    %85 = arith.cmpi sge, %84, %c1_i32_22 : i32
    %c8_i32_23 = arith.constant 8 : i32
    %86 = arith.addi %83, %c8_i32_23 : i32
    %c0_i32_24 = arith.constant 0 : i32
    %87 = arith.select %85, %c0_i32_24, %86 : i32
    %88 = tpu.assume_multiple %87, 8 : i32
    %c0_25 = arith.constant 0 : index
    %89 = arith.index_cast %83 : i32 to index
    %c0_26 = arith.constant 0 : index
    %90 = vector.load %arg3[%c0_25, %89, %c0_26] : memref<2x8x128xf32, #tpu.memory_space<vmem>>, vector<1x8x128xf32>
    %91 = vector.shape_cast %90 : vector<1x8x128xf32> to vector<8x128xf32>
    %c0_27 = arith.constant 0 : index
    %92 = arith.index_cast %88 : i32 to index
    %c0_28 = arith.constant 0 : index
    %93 = vector.load %arg3[%c0_27, %92, %c0_28] : memref<2x8x128xf32, #tpu.memory_space<vmem>>, vector<1x8x128xf32>
    %94 = vector.shape_cast %93 : vector<1x8x128xf32> to vector<8x128xf32>
    %95 = arith.select %85, %79, %94 : vector<8x128xf32>
    %96 = arith.select %3, %95, %91 : vector<8x128xi1>, vector<8x128xf32>
    %c7_i32 = arith.constant 7 : i32
    %97 = tpu.dynamic_rotate %96 by %c7_i32 dim 0 : vector<8x128xf32>, i32 -> vector<8x128xf32>
    %c1_29 = arith.constant 1 : index
    %98 = arith.index_cast %83 : i32 to index
    %c0_30 = arith.constant 0 : index
    %99 = vector.load %arg3[%c1_29, %98, %c0_30] : memref<2x8x128xf32, #tpu.memory_space<vmem>>, vector<1x8x128xf32>
    %100 = vector.shape_cast %99 : vector<1x8x128xf32> to vector<8x128xf32>
    %c1_31 = arith.constant 1 : index
    %101 = arith.index_cast %88 : i32 to index
    %c0_32 = arith.constant 0 : index
    %102 = vector.load %arg3[%c1_31, %101, %c0_32] : memref<2x8x128xf32, #tpu.memory_space<vmem>>, vector<1x8x128xf32>
    %103 = vector.shape_cast %102 : vector<1x8x128xf32> to vector<8x128xf32>
    %104 = arith.select %85, %81, %103 : vector<8x128xf32>
    %105 = arith.select %3, %104, %100 : vector<8x128xi1>, vector<8x128xf32>
    %c7_i32_33 = arith.constant 7 : i32
    %106 = tpu.dynamic_rotate %105 by %c7_i32_33 dim 0 : vector<8x128xf32>, i32 -> vector<8x128xf32>
    %c127_i32_34 = arith.constant 127 : i32
    %107 = tpu.dynamic_rotate %91 by %c127_i32_34 dim 1 : vector<8x128xf32>, i32 -> vector<8x128xf32>
    %c127_i32_35 = arith.constant 127 : i32
    %108 = tpu.dynamic_rotate %97 by %c127_i32_35 dim 1 : vector<8x128xf32>, i32 -> vector<8x128xf32>
    %109 = arith.select %5, %107, %108 : vector<8x128xi1>, vector<8x128xf32>
    %c127_i32_36 = arith.constant 127 : i32
    %110 = tpu.dynamic_rotate %100 by %c127_i32_36 dim 1 : vector<8x128xf32>, i32 -> vector<8x128xf32>
    %c127_i32_37 = arith.constant 127 : i32
    %111 = tpu.dynamic_rotate %106 by %c127_i32_37 dim 1 : vector<8x128xf32>, i32 -> vector<8x128xf32>
    %112 = arith.select %5, %110, %111 : vector<8x128xi1>, vector<8x128xf32>
    %c126_i32_38 = arith.constant 126 : i32
    %113 = tpu.dynamic_rotate %91 by %c126_i32_38 dim 1 : vector<8x128xf32>, i32 -> vector<8x128xf32>
    %c126_i32_39 = arith.constant 126 : i32
    %114 = tpu.dynamic_rotate %97 by %c126_i32_39 dim 1 : vector<8x128xf32>, i32 -> vector<8x128xf32>
    %115 = arith.select %7, %113, %114 : vector<8x128xi1>, vector<8x128xf32>
    %c126_i32_40 = arith.constant 126 : i32
    %116 = tpu.dynamic_rotate %100 by %c126_i32_40 dim 1 : vector<8x128xf32>, i32 -> vector<8x128xf32>
    %c126_i32_41 = arith.constant 126 : i32
    %117 = tpu.dynamic_rotate %106 by %c126_i32_41 dim 1 : vector<8x128xf32>, i32 -> vector<8x128xf32>
    %118 = arith.select %7, %116, %117 : vector<8x128xi1>, vector<8x128xf32>
    %c125_i32_42 = arith.constant 125 : i32
    %119 = tpu.dynamic_rotate %91 by %c125_i32_42 dim 1 : vector<8x128xf32>, i32 -> vector<8x128xf32>
    %c125_i32_43 = arith.constant 125 : i32
    %120 = tpu.dynamic_rotate %97 by %c125_i32_43 dim 1 : vector<8x128xf32>, i32 -> vector<8x128xf32>
    %121 = arith.select %9, %119, %120 : vector<8x128xi1>, vector<8x128xf32>
    %c125_i32_44 = arith.constant 125 : i32
    %122 = tpu.dynamic_rotate %100 by %c125_i32_44 dim 1 : vector<8x128xf32>, i32 -> vector<8x128xf32>
    %c125_i32_45 = arith.constant 125 : i32
    %123 = tpu.dynamic_rotate %106 by %c125_i32_45 dim 1 : vector<8x128xf32>, i32 -> vector<8x128xf32>
    %124 = arith.select %9, %122, %123 : vector<8x128xi1>, vector<8x128xf32>
    %c124_i32_46 = arith.constant 124 : i32
    %125 = tpu.dynamic_rotate %91 by %c124_i32_46 dim 1 : vector<8x128xf32>, i32 -> vector<8x128xf32>
    %c124_i32_47 = arith.constant 124 : i32
    %126 = tpu.dynamic_rotate %97 by %c124_i32_47 dim 1 : vector<8x128xf32>, i32 -> vector<8x128xf32>
    %127 = arith.select %11, %125, %126 : vector<8x128xi1>, vector<8x128xf32>
    %c124_i32_48 = arith.constant 124 : i32
    %128 = tpu.dynamic_rotate %100 by %c124_i32_48 dim 1 : vector<8x128xf32>, i32 -> vector<8x128xf32>
    %c124_i32_49 = arith.constant 124 : i32
    %129 = tpu.dynamic_rotate %106 by %c124_i32_49 dim 1 : vector<8x128xf32>, i32 -> vector<8x128xf32>
    %130 = arith.select %11, %128, %129 : vector<8x128xi1>, vector<8x128xf32>
    %c123_i32_50 = arith.constant 123 : i32
    %131 = tpu.dynamic_rotate %91 by %c123_i32_50 dim 1 : vector<8x128xf32>, i32 -> vector<8x128xf32>
    %c123_i32_51 = arith.constant 123 : i32
    %132 = tpu.dynamic_rotate %97 by %c123_i32_51 dim 1 : vector<8x128xf32>, i32 -> vector<8x128xf32>
    %133 = arith.select %13, %131, %132 : vector<8x128xi1>, vector<8x128xf32>
    %c123_i32_52 = arith.constant 123 : i32
    %134 = tpu.dynamic_rotate %100 by %c123_i32_52 dim 1 : vector<8x128xf32>, i32 -> vector<8x128xf32>
    %c123_i32_53 = arith.constant 123 : i32
    %135 = tpu.dynamic_rotate %106 by %c123_i32_53 dim 1 : vector<8x128xf32>, i32 -> vector<8x128xf32>
    %136 = arith.select %13, %134, %135 : vector<8x128xi1>, vector<8x128xf32>
    %c122_i32_54 = arith.constant 122 : i32
    %137 = tpu.dynamic_rotate %91 by %c122_i32_54 dim 1 : vector<8x128xf32>, i32 -> vector<8x128xf32>
    %c122_i32_55 = arith.constant 122 : i32
    %138 = tpu.dynamic_rotate %97 by %c122_i32_55 dim 1 : vector<8x128xf32>, i32 -> vector<8x128xf32>
    %139 = arith.select %15, %137, %138 : vector<8x128xi1>, vector<8x128xf32>
    %c122_i32_56 = arith.constant 122 : i32
    %140 = tpu.dynamic_rotate %100 by %c122_i32_56 dim 1 : vector<8x128xf32>, i32 -> vector<8x128xf32>
    %c122_i32_57 = arith.constant 122 : i32
    %141 = tpu.dynamic_rotate %106 by %c122_i32_57 dim 1 : vector<8x128xf32>, i32 -> vector<8x128xf32>
    %142 = arith.select %15, %140, %141 : vector<8x128xi1>, vector<8x128xf32>
    %c121_i32_58 = arith.constant 121 : i32
    %143 = tpu.dynamic_rotate %91 by %c121_i32_58 dim 1 : vector<8x128xf32>, i32 -> vector<8x128xf32>
    %c121_i32_59 = arith.constant 121 : i32
    %144 = tpu.dynamic_rotate %97 by %c121_i32_59 dim 1 : vector<8x128xf32>, i32 -> vector<8x128xf32>
    %145 = arith.select %17, %143, %144 : vector<8x128xi1>, vector<8x128xf32>
    %c121_i32_60 = arith.constant 121 : i32
    %146 = tpu.dynamic_rotate %100 by %c121_i32_60 dim 1 : vector<8x128xf32>, i32 -> vector<8x128xf32>
    %c121_i32_61 = arith.constant 121 : i32
    %147 = tpu.dynamic_rotate %106 by %c121_i32_61 dim 1 : vector<8x128xf32>, i32 -> vector<8x128xf32>
    %148 = arith.select %17, %146, %147 : vector<8x128xi1>, vector<8x128xf32>
    %149 = vector.broadcast %18 : f32 to vector<8x128xf32>
    %150 = arith.mulf %149, %100 : vector<8x128xf32>
    %151 = vector.broadcast %19 : f32 to vector<8x128xf32>
    %152 = arith.mulf %151, %109 : vector<8x128xf32>
    %153 = arith.addf %150, %152 : vector<8x128xf32>
    %154 = vector.broadcast %20 : f32 to vector<8x128xf32>
    %155 = arith.mulf %154, %112 : vector<8x128xf32>
    %156 = arith.addf %153, %155 : vector<8x128xf32>
    %157 = vector.broadcast %21 : f32 to vector<8x128xf32>
    %158 = arith.mulf %157, %115 : vector<8x128xf32>
    %159 = arith.addf %156, %158 : vector<8x128xf32>
    %160 = vector.broadcast %22 : f32 to vector<8x128xf32>
    %161 = arith.mulf %160, %118 : vector<8x128xf32>
    %162 = arith.addf %159, %161 : vector<8x128xf32>
    %163 = vector.broadcast %23 : f32 to vector<8x128xf32>
    %164 = arith.mulf %163, %121 : vector<8x128xf32>
    %165 = arith.addf %162, %164 : vector<8x128xf32>
    %166 = vector.broadcast %24 : f32 to vector<8x128xf32>
    %167 = arith.mulf %166, %124 : vector<8x128xf32>
    %168 = arith.addf %165, %167 : vector<8x128xf32>
    %169 = vector.broadcast %25 : f32 to vector<8x128xf32>
    %170 = arith.mulf %169, %127 : vector<8x128xf32>
    %171 = arith.addf %168, %170 : vector<8x128xf32>
    %172 = vector.broadcast %26 : f32 to vector<8x128xf32>
    %173 = arith.mulf %172, %130 : vector<8x128xf32>
    %174 = arith.addf %171, %173 : vector<8x128xf32>
    %175 = vector.broadcast %27 : f32 to vector<8x128xf32>
    %176 = arith.mulf %175, %133 : vector<8x128xf32>
    %177 = arith.addf %174, %176 : vector<8x128xf32>
    %178 = vector.broadcast %28 : f32 to vector<8x128xf32>
    %179 = arith.mulf %178, %136 : vector<8x128xf32>
    %180 = arith.addf %177, %179 : vector<8x128xf32>
    %181 = vector.broadcast %29 : f32 to vector<8x128xf32>
    %182 = arith.mulf %181, %139 : vector<8x128xf32>
    %183 = arith.addf %180, %182 : vector<8x128xf32>
    %184 = vector.broadcast %30 : f32 to vector<8x128xf32>
    %185 = arith.mulf %184, %142 : vector<8x128xf32>
    %186 = arith.addf %183, %185 : vector<8x128xf32>
    %187 = vector.broadcast %31 : f32 to vector<8x128xf32>
    %188 = arith.mulf %187, %145 : vector<8x128xf32>
    %189 = arith.addf %186, %188 : vector<8x128xf32>
    %190 = vector.broadcast %32 : f32 to vector<8x128xf32>
    %191 = arith.mulf %190, %148 : vector<8x128xf32>
    %192 = arith.addf %189, %191 : vector<8x128xf32>
    %193 = vector.broadcast %33 : f32 to vector<8x128xf32>
    %194 = arith.mulf %193, %115 : vector<8x128xf32>
    %195 = vector.broadcast %34 : f32 to vector<8x128xf32>
    %196 = arith.mulf %195, %118 : vector<8x128xf32>
    %197 = arith.addf %194, %196 : vector<8x128xf32>
    %198 = vector.broadcast %35 : f32 to vector<8x128xf32>
    %199 = arith.mulf %198, %121 : vector<8x128xf32>
    %200 = arith.addf %197, %199 : vector<8x128xf32>
    %201 = vector.broadcast %36 : f32 to vector<8x128xf32>
    %202 = arith.mulf %201, %124 : vector<8x128xf32>
    %203 = arith.addf %200, %202 : vector<8x128xf32>
    %204 = vector.broadcast %37 : f32 to vector<8x128xf32>
    %205 = arith.mulf %204, %127 : vector<8x128xf32>
    %206 = arith.addf %203, %205 : vector<8x128xf32>
    %207 = vector.broadcast %38 : f32 to vector<8x128xf32>
    %208 = arith.mulf %207, %130 : vector<8x128xf32>
    %209 = arith.addf %206, %208 : vector<8x128xf32>
    %210 = vector.broadcast %39 : f32 to vector<8x128xf32>
    %211 = arith.mulf %210, %133 : vector<8x128xf32>
    %212 = arith.addf %209, %211 : vector<8x128xf32>
    %213 = vector.broadcast %40 : f32 to vector<8x128xf32>
    %214 = arith.mulf %213, %136 : vector<8x128xf32>
    %215 = arith.addf %212, %214 : vector<8x128xf32>
    %216 = vector.broadcast %41 : f32 to vector<8x128xf32>
    %217 = arith.mulf %216, %139 : vector<8x128xf32>
    %218 = arith.addf %215, %217 : vector<8x128xf32>
    %219 = arith.mulf %115, %218 : vector<8x128xf32>
    %220 = vector.broadcast %42 : f32 to vector<8x128xf32>
    %221 = arith.mulf %220, %118 : vector<8x128xf32>
    %222 = vector.broadcast %43 : f32 to vector<8x128xf32>
    %223 = arith.mulf %222, %121 : vector<8x128xf32>
    %224 = arith.addf %221, %223 : vector<8x128xf32>
    %225 = vector.broadcast %44 : f32 to vector<8x128xf32>
    %226 = arith.mulf %225, %124 : vector<8x128xf32>
    %227 = arith.addf %224, %226 : vector<8x128xf32>
    %228 = vector.broadcast %45 : f32 to vector<8x128xf32>
    %229 = arith.mulf %228, %127 : vector<8x128xf32>
    %230 = arith.addf %227, %229 : vector<8x128xf32>
    %231 = vector.broadcast %46 : f32 to vector<8x128xf32>
    %232 = arith.mulf %231, %130 : vector<8x128xf32>
    %233 = arith.addf %230, %232 : vector<8x128xf32>
    %234 = vector.broadcast %47 : f32 to vector<8x128xf32>
    %235 = arith.mulf %234, %133 : vector<8x128xf32>
    %236 = arith.addf %233, %235 : vector<8x128xf32>
    %237 = vector.broadcast %48 : f32 to vector<8x128xf32>
    %238 = arith.mulf %237, %136 : vector<8x128xf32>
    %239 = arith.addf %236, %238 : vector<8x128xf32>
    %240 = vector.broadcast %49 : f32 to vector<8x128xf32>
    %241 = arith.mulf %240, %139 : vector<8x128xf32>
    %242 = arith.addf %239, %241 : vector<8x128xf32>
    %243 = arith.mulf %118, %242 : vector<8x128xf32>
    %244 = arith.addf %219, %243 : vector<8x128xf32>
    %245 = vector.broadcast %50 : f32 to vector<8x128xf32>
    %246 = arith.mulf %245, %121 : vector<8x128xf32>
    %247 = vector.broadcast %51 : f32 to vector<8x128xf32>
    %248 = arith.mulf %247, %124 : vector<8x128xf32>
    %249 = arith.addf %246, %248 : vector<8x128xf32>
    %250 = vector.broadcast %52 : f32 to vector<8x128xf32>
    %251 = arith.mulf %250, %127 : vector<8x128xf32>
    %252 = arith.addf %249, %251 : vector<8x128xf32>
    %253 = vector.broadcast %53 : f32 to vector<8x128xf32>
    %254 = arith.mulf %253, %130 : vector<8x128xf32>
    %255 = arith.addf %252, %254 : vector<8x128xf32>
    %256 = vector.broadcast %54 : f32 to vector<8x128xf32>
    %257 = arith.mulf %256, %133 : vector<8x128xf32>
    %258 = arith.addf %255, %257 : vector<8x128xf32>
    %259 = vector.broadcast %55 : f32 to vector<8x128xf32>
    %260 = arith.mulf %259, %136 : vector<8x128xf32>
    %261 = arith.addf %258, %260 : vector<8x128xf32>
    %262 = vector.broadcast %56 : f32 to vector<8x128xf32>
    %263 = arith.mulf %262, %139 : vector<8x128xf32>
    %264 = arith.addf %261, %263 : vector<8x128xf32>
    %265 = arith.mulf %121, %264 : vector<8x128xf32>
    %266 = arith.addf %244, %265 : vector<8x128xf32>
    %267 = vector.broadcast %57 : f32 to vector<8x128xf32>
    %268 = arith.mulf %267, %124 : vector<8x128xf32>
    %269 = vector.broadcast %58 : f32 to vector<8x128xf32>
    %270 = arith.mulf %269, %127 : vector<8x128xf32>
    %271 = arith.addf %268, %270 : vector<8x128xf32>
    %272 = vector.broadcast %59 : f32 to vector<8x128xf32>
    %273 = arith.mulf %272, %130 : vector<8x128xf32>
    %274 = arith.addf %271, %273 : vector<8x128xf32>
    %275 = vector.broadcast %60 : f32 to vector<8x128xf32>
    %276 = arith.mulf %275, %133 : vector<8x128xf32>
    %277 = arith.addf %274, %276 : vector<8x128xf32>
    %278 = vector.broadcast %61 : f32 to vector<8x128xf32>
    %279 = arith.mulf %278, %136 : vector<8x128xf32>
    %280 = arith.addf %277, %279 : vector<8x128xf32>
    %281 = vector.broadcast %62 : f32 to vector<8x128xf32>
    %282 = arith.mulf %281, %139 : vector<8x128xf32>
    %283 = arith.addf %280, %282 : vector<8x128xf32>
    %284 = arith.mulf %124, %283 : vector<8x128xf32>
    %285 = arith.addf %266, %284 : vector<8x128xf32>
    %286 = vector.broadcast %63 : f32 to vector<8x128xf32>
    %287 = arith.mulf %286, %127 : vector<8x128xf32>
    %288 = vector.broadcast %64 : f32 to vector<8x128xf32>
    %289 = arith.mulf %288, %130 : vector<8x128xf32>
    %290 = arith.addf %287, %289 : vector<8x128xf32>
    %291 = vector.broadcast %65 : f32 to vector<8x128xf32>
    %292 = arith.mulf %291, %133 : vector<8x128xf32>
    %293 = arith.addf %290, %292 : vector<8x128xf32>
    %294 = vector.broadcast %66 : f32 to vector<8x128xf32>
    %295 = arith.mulf %294, %136 : vector<8x128xf32>
    %296 = arith.addf %293, %295 : vector<8x128xf32>
    %297 = vector.broadcast %67 : f32 to vector<8x128xf32>
    %298 = arith.mulf %297, %139 : vector<8x128xf32>
    %299 = arith.addf %296, %298 : vector<8x128xf32>
    %300 = arith.mulf %127, %299 : vector<8x128xf32>
    %301 = arith.addf %285, %300 : vector<8x128xf32>
    %302 = vector.broadcast %68 : f32 to vector<8x128xf32>
    %303 = arith.mulf %302, %130 : vector<8x128xf32>
    %304 = vector.broadcast %69 : f32 to vector<8x128xf32>
    %305 = arith.mulf %304, %133 : vector<8x128xf32>
    %306 = arith.addf %303, %305 : vector<8x128xf32>
    %307 = vector.broadcast %70 : f32 to vector<8x128xf32>
    %308 = arith.mulf %307, %136 : vector<8x128xf32>
    %309 = arith.addf %306, %308 : vector<8x128xf32>
    %310 = vector.broadcast %71 : f32 to vector<8x128xf32>
    %311 = arith.mulf %310, %139 : vector<8x128xf32>
    %312 = arith.addf %309, %311 : vector<8x128xf32>
    %313 = arith.mulf %130, %312 : vector<8x128xf32>
    %314 = arith.addf %301, %313 : vector<8x128xf32>
    %315 = vector.broadcast %72 : f32 to vector<8x128xf32>
    %316 = arith.mulf %315, %133 : vector<8x128xf32>
    %317 = vector.broadcast %73 : f32 to vector<8x128xf32>
    %318 = arith.mulf %317, %136 : vector<8x128xf32>
    %319 = arith.addf %316, %318 : vector<8x128xf32>
    %320 = vector.broadcast %74 : f32 to vector<8x128xf32>
    %321 = arith.mulf %320, %139 : vector<8x128xf32>
    %322 = arith.addf %319, %321 : vector<8x128xf32>
    %323 = arith.mulf %133, %322 : vector<8x128xf32>
    %324 = arith.addf %314, %323 : vector<8x128xf32>
    %325 = vector.broadcast %75 : f32 to vector<8x128xf32>
    %326 = arith.mulf %325, %136 : vector<8x128xf32>
    %327 = vector.broadcast %76 : f32 to vector<8x128xf32>
    %328 = arith.mulf %327, %139 : vector<8x128xf32>
    %329 = arith.addf %326, %328 : vector<8x128xf32>
    %330 = arith.mulf %136, %329 : vector<8x128xf32>
    %331 = arith.addf %324, %330 : vector<8x128xf32>
    %332 = vector.broadcast %77 : f32 to vector<8x128xf32>
    %333 = arith.mulf %332, %139 : vector<8x128xf32>
    %334 = arith.mulf %139, %333 : vector<8x128xf32>
    %335 = arith.addf %331, %334 : vector<8x128xf32>
    %336 = arith.addf %192, %335 : vector<8x128xf32>
    %337 = arith.index_cast %83 : i32 to index
    %c0_62 = arith.constant 0 : index
    %338 = vector.load %arg5[%337, %c0_62] : memref<8x128xf32, #tpu.memory_space<vmem>>, vector<8x128xf32>
    tpu.vector_store %arg5[%337, %c0_62], %336 {strides = array<i32>} : memref<8x128xf32, #tpu.memory_space<vmem>>, vector<8x128xf32>,
    %c1_i32_63 = arith.constant 1 : i32
    return
  }
  func.func @transform_0(%arg0: i32, %arg1: memref<15xf32, #tpu.memory_space<smem>>, %arg2: memref<45xf32, #tpu.memory_space<smem>>) -> (i32, i32, i32) {
    %c0_i32 = arith.constant 0 : i32
    %c0_i32_0 = arith.constant 0 : i32
    %c0_i32_1 = arith.constant 0 : i32
    return %c0_i32, %arg0, %c0_i32_0 : i32, i32, i32
  }
  func.func @transform_1(%arg0: i32, %arg1: memref<15xf32, #tpu.memory_space<smem>>, %arg2: memref<45xf32, #tpu.memory_space<smem>>) -> (i32, i32, i32) {
    %c1_i32 = arith.constant 1 : i32
    %0 = arith.addi %arg0, %c1_i32 : i32
    %c1_i32_0 = arith.constant 1 : i32
    %1 = arith.muli %0, %c1_i32_0 : i32
    %c0_i32 = arith.constant 0 : i32
    %c0_i32_1 = arith.constant 0 : i32
    %c0_i32_2 = arith.constant 0 : i32
    return %c0_i32, %1, %c0_i32_1 : i32, i32, i32
  }
  func.func @transform_2(%arg0: i32, %arg1: memref<15xf32, #tpu.memory_space<smem>>, %arg2: memref<45xf32, #tpu.memory_space<smem>>) -> (i32, i32) {
    %c0_i32 = arith.constant 0 : i32
    %c0_i32_0 = arith.constant 0 : i32
    return %arg0, %c0_i32 : i32, i32
  }
}

</mosaic_0001>

<bundles_post_ra>
// kernel: second_order_volterra.1
= control target key start
LH: loop header
LB: loop body
LE: loop exit
PB: predicated region body
PF: predicated region fallthrough
CT: control target
= control target key end

     0   :  { %s1039_s0 = inlined_call_operand.vmem [shape: f32[15], index: 0, kind: input, shape index: {}]   ;;  %s1040_s2 = inlined_call_operand.vmem [shape: f32[2,16,128], index: 2, kind: input, shape index: {}, may-alias: {2,3}]   ;;  %s1041_s3 = inlined_call_operand.vmem [shape: f32[2,16,128], index: 3, kind: input, shape index: {}, may-alias: {2,3}]   ;;  %s1042_s4 = inlined_call_operand.vmem [shape: f32[8,128], index: 4, kind: output, shape index: {}]   ;;  %s1043_s1 = inlined_call_operand.vmem [shape: f32[45], index: 1, kind: input, shape index: {}]  }
   0x1   :  { %1084 = sst [smem:[#allocation45_spill]] %s1042_s4  ;;  %s9_s17 = sshll.u32 %s1039_s0, 4  ;;  %s10_s17 = int_to_ptr.vmem [resolvable:$true] %s9_s17 }
   0x2   :  { %s13_s20 = sshll.u32 %s1043_s1, 4  ;;  %s530_s21 = scalar_lea.vmem %s10_s17, 16  ;;  %s14_s20 = int_to_ptr.vmem [resolvable:$true] %s13_s20 }
   0x3   :  { %p531_p0 = scmp.ne.s32.totalorder %s10_s17, %s530_s21  ;;  %p535_p1 = scmp.lt.s32.totalorder %s10_s17, %s10_s17 }
   0x4   :  { %p536_p2 = scmp.lt.s32.totalorder %s530_s21, %s530_s21 }
   0x6   :  { %p537_p3 = por %p536_p2, %p535_p1 }
   0x8   :  { %p538_p4 = pnand %p537_p3, %p531_p0 }
   0xa   :  { %541 = shalt.err (!%p538_p4)  }
   0xb   :  { %s556_s22 = smov [#allocation3]   ;;  %s542_s23 = scalar_lea.vmem %s14_s20, 16 }
   0xc   :  { %12 = dma.vmem_to_smem %s10_s17, 16, %s556_s22, [#allocation2] }
   0xd   :  { %p543_p5 = scmp.ne.s32.totalorder %s14_s20, %s542_s23  ;;  %p547_p6 = scmp.lt.s32.totalorder %s14_s20, %s14_s20 }
   0xe   :  { %p548_p7 = scmp.lt.s32.totalorder %s542_s23, %s542_s23 }
  0x10   :  { %p549_p8 = por %p548_p7, %p547_p6 }
  0x12   :  { %p550_p9 = pnand %p549_p8, %p543_p5 }
  0x14   :  { %553 = shalt.err (!%p550_p9)  }
  0x15   :  { %s557_s0 = smov [#allocation4]  }
  0x16   :  { %16 = dma.vmem_to_smem %s14_s20, 16, %s557_s0, [#allocation2] }
  0x17   :  { %554 = dma.done.wait [#allocation2], 32 }
  0x18   :  { %555 = vsyncadd [#allocation2], 4294967264 }
  0x19   :  { %18 = sfence }
  0x1a   :  { %v51_v0 = vld [vmem:[%s1040_s2] sm:$0xff]  ;;  %v602_v1 = vld [vmem:[%s1040_s2 + $0x10] sm:$0xff]  ;;  %v105_v2 = vlaneseq  ;;  %s558_s27 = smov 126   ;;  %v462_v3 = vld [vmem:[%s1041_s3 + $0x18] sm:$0xff]  ;;  %s559_s6 = smov 125  }
  0x1b   :  { %198 = vrot.lane.b32.xlu0 %v51_v0, %s558_s27  ;;  %203 = vrot.lane.b32.xlu1 %v602_v1, %s558_s27  ;;  %v461_v5 = vld [vmem:[%s1041_s3 + $0x8] sm:$0xff]  ;;  %s560_s2 = smov 127   ;;  %s561_s7 = smov 124  }
  0x1c   :  { %v108_v4 = vshrl.u32 %v105_v2, 7  ;;  %s562_s3 = smov 123   ;;  %s563_s8 = smov 122   ;;  %v710_v13 = vand.u32 127, %v105_v2 }
  0x1d   :  { %s564_s9 = smov 121   ;;  %s619_s10 = sld [smem:[#allocation3 + $0x4]] }
  0x1e   :  { %vm109_vm0 = vcmp.eq.s32.totalorder %v108_v4, 0  ;;  %s621_s11 = sld [smem:[#allocation4 + $0x1]]  ;;  %vm111_vm1 = vcmp.lt.s32.totalorder %v710_v13, 126  ;;  %vm110_vm2 = vcmp.lt.s32.totalorder %v710_v13, 127  ;;  %vm112_vm3 = vcmp.lt.s32.totalorder %v710_v13, 125 }
  0x1f   :  { %208 = vrot.lane.b32.xlu0 %v51_v0, %s559_s6  ;;  %v186_v6 = vsel %vm109_vm0, %v462_v3, %v602_v1  ;;  %v181_v7 = vsel %vm109_vm0, %v461_v5, %v51_v0  ;;  %s623_s12 = sld [smem:[#allocation4 + $0x9]]  ;;  %vm113_vm4 = vcmp.lt.s32.totalorder %v710_v13, 124  ;;  %vm114_vm5 = vcmp.lt.s32.totalorder %v710_v13, 123 }
  0x20   :  { %v187_v8 = vrot.slane %v186_v6, 1  ;;  %v182_v9 = vrot.slane %v181_v7, 1  ;;  %s625_s13 = sld [smem:[#allocation3 + $0x3]]  ;;  %vm115_vm6 = vcmp.lt.s32.totalorder %v710_v13, 122  ;;  %vm116_vm7 = vcmp.lt.s32.totalorder %v710_v13, 121 }
  0x21   :  { %s627_s14 = sld [smem:[#allocation4]] }
  0x22   :  { %205 = vrot.lane.b32.xlu1 %v187_v8, %s558_s27  ;;  %s629_s15 = sld [smem:[#allocation3 + $0x5]] }
  0x23   :  { %200 = vrot.lane.b32.xlu0 %v182_v9, %s558_s27  ;;  %1085 = sst [smem:[#allocation8_spill]] %s619_s10  ;;  %v269_v16 = vstv %s619_s10 }
  0x24   :  { %s631_s16 = sld [smem:[#allocation4 + $0x2]]  ;;  %v304_v17 = vstv %s621_s11 }
  0x25   :  { %1086 = sst [smem:[#allocation9_spill]] %s623_s12  ;;  %v329_v18 = vstv %s623_s12 }
  0x26   :  { %210 = vrot.lane.b32.xlu1 %v182_v9, %s559_s6  ;;  %1087 = sst [smem:[#allocation10_spill]] %s625_s13  ;;  %v266_v20 = vstv %s625_s13 }
  0x27   :  { %213 = vrot.lane.b32.xlu0 %v602_v1, %s559_s6  ;;  %s633_s17 = sld [smem:[#allocation4 + $0xa]]  ;;  %v302_v21 = vstv %s627_s14 }
  0x28   :  { %1088 = sst [smem:[#allocation11_spill]] %s629_s15  ;;  %v272_v22 = vstv %s629_s15 }
  0x29   :  { %s635_s18 = sld [smem:[#allocation4 + $0x11]] }
  0x2a   :  { %215 = vrot.lane.b32.xlu1 %v187_v8, %s559_s6  ;;  %1089 = sst [smem:[#allocation12_spill]] %s631_s16  ;;  %v307_v23 = vstv %s631_s16 }
  0x2b   :  { %188 = vrot.lane.b32.xlu0 %v51_v0, %s560_s2  ;;  %s637_s19 = sld [smem:[#allocation3 + $0x6]] }
  0x2c   :  { %s639_s20 = sld [smem:[#allocation4 + $0x3]] }
  0x2d   :  { %1090 = sst [smem:[#allocation13_spill]] %s633_s17  ;;  %v331_v24 = vstv %s633_s17 }
  0x2e   :  { %190 = vrot.lane.b32.xlu1 %v182_v9, %s560_s2  ;;  %s641_s21 = sld [smem:[#allocation4 + $0xb]] }
  0x2f   :  { %218 = vrot.lane.b32.xlu0 %v51_v0, %s561_s7  ;;  %1091 = sst [smem:[#allocation14_spill]] %s635_s18  ;;  %v354_v25 = vstv %s635_s18 }
  0x30   :  { %s643_s22 = sld [smem:[#allocation4 + $0x12]] }
  0x31   :  { %1092 = sst [smem:[#allocation15_spill]] %s637_s19  ;;  %v275_v27 = vstv %s637_s19 }
  0x32   :  { %220 = vrot.lane.b32.xlu1 %v182_v9, %s561_s7  ;;  %1093 = sst [smem:[#allocation16_spill]] %s639_s20  ;;  %v310_v28 = vstv %s639_s20 }
  0x33   :  { %193 = vrot.lane.b32.xlu0 %v602_v1, %s560_s2  ;;  %s645_s23 = sld [smem:[#allocation4 + $0x18]] }
  0x34   :  { %1094 = sst [smem:[#allocation17_spill]] %s641_s21  ;;  %v334_v29 = vstv %s641_s21 }
  0x35   :  { %s647_s0 = sld [smem:[#allocation3]] }
  0x36   :  { %195 = vrot.lane.b32.xlu1 %v187_v8, %s560_s2  ;;  %1095 = sst [smem:[#allocation18_spill]] %s643_s22  ;;  %v356_v30 = vstv %s643_s22 }
  0x37   :  { %223 = vrot.lane.b32.xlu0 %v602_v1, %s561_s7  ;;  %s649_s1 = sld [smem:[#allocation3 + $0x1]] }
  0x38   :  { %s651_s24 = sld [smem:[#allocation3 + $0x7]] }
  0x39   :  { %1096 = sst [smem:[#allocation19_spill]] %s645_s23  ;;  %v376_v31 = vstv %s645_s23 }
  0x3a   :  { %225 = vrot.lane.b32.xlu1 %v187_v8, %s561_s7  ;;  %s653_s25 = sld [smem:[#allocation4 + $0x4]] }
  0x3b   :  { %228 = vrot.lane.b32.xlu0 %v51_v0, %s562_s3  ;;  %s655_s26 = sld [smem:[#allocation4 + $0xc]]  ;;  %v258_v19 = vstv %s647_s0 }
  0x3c   :  { %s657_s27 = sld [smem:[#allocation4 + $0x13]]  ;;  %v259_v33 = vmul.f32 %v258_v19, %v602_v1 }
  0x3d   :  { %s659_s28 = sld [smem:[#allocation4 + $0x19]]  ;;  %v260_v34 = vstv %s649_s1 }
  0x3e   :  { %230 = vrot.lane.b32.xlu1 %v182_v9, %s562_s3  ;;  %1097 = sst [smem:[#allocation20_spill]] %s651_s24  ;;  %v278_v35 = vstv %s651_s24 }
  0x3f   :  { %233 = vrot.lane.b32.xlu0 %v602_v1, %s562_s3  ;;  %s661_s29 = sld [smem:[#allocation4 + $0x1e]] }
  0x40   :  { %s663_s30 = sld [smem:[#allocation3 + $0x2]]  ;;  %v313_v36 = vstv %s653_s25 }
  0x41   :  { %1098 = sst [smem:[#allocation21_spill]] %s655_s26  ;;  %v337_v37 = vstv %s655_s26 }
  0x42   :  { %235 = vrot.lane.b32.xlu1 %v187_v8, %s562_s3  ;;  %1099 = sst [smem:[#allocation22_spill]] %s657_s27  ;;  %v359_v38 = vstv %s657_s27 }
  0x43   :  { %238 = vrot.lane.b32.xlu0 %v51_v0, %s563_s8  ;;  %1100 = sst [smem:[#allocation23_spill]] %s659_s28 }
  0x44   :  { %s665_s5 = sld [smem:[#allocation4 + $0x5]] }
  0x45   :  { %1101 = sst [smem:[#allocation24_spill]] %s661_s29 }
  0x46   :  { %240 = vrot.lane.b32.xlu1 %v182_v9, %s563_s8  ;;  %1102 = sst [smem:[#allocation25_spill]] %s663_s30 }
  0x47   :  { %243 = vrot.lane.b32.xlu0 %v602_v1, %s563_s8  ;;  %s667_s6 = sld [smem:[#allocation4 + $0xd]] }
  0x48   :  { %s669_s2 = sld [smem:[#allocation4 + $0x14]] }
  0x49   :  { %s671_s7 = sld [smem:[#allocation4 + $0x1a]] }
  0x4a   :  { %245 = vrot.lane.b32.xlu1 %v187_v8, %s563_s8  ;;  %1103 = sst [smem:[#allocation26_spill]] %s665_s5 }
  0x4b   :  { %248 = vrot.lane.b32.xlu0 %v51_v0, %s564_s9  ;;  %s673_s3 = sld [smem:[#allocation4 + $0x1f]] }
  0x4c   :  { %s675_s8 = sld [smem:[#allocation4 + $0x23]] }
  0x4d   :  { %1104 = sst [smem:[#allocation27_spill]] %s667_s6 }
  0x4e   :  { %250 = vrot.lane.b32.xlu1 %v182_v9, %s564_s9  ;;  %1105 = sst [smem:[#allocation28_spill]] %s669_s2 }
  0x4f   :  { %253 = vrot.lane.b32.xlu0 %v602_v1, %s564_s9  ;;  %1106 = sst [smem:[#allocation29_spill]] %s671_s7 }
  0x50   :  { %s679_s4 = sld [smem:[#allocation4 + $0xe]] }
  0x51   :  { %s681_s28 = sld [smem:[#allocation4 + $0x15]]  ;;  %v397_v48 = vstv %s673_s3 }
  0x52   :  { %255 = vrot.lane.b32.xlu1 %v187_v8, %s564_s9  ;;  %s677_s9 = sld [smem:[#allocation4 + $0x6]]  ;;  %v411_v49 = vstv %s675_s8 }
  0x53   :  { %s683_s29 = sld [smem:[#allocation4 + $0x1b]] }
  0x54   :  { %s685_s30 = sld [smem:[#allocation4 + $0x20]] }
  0x55   :  { %s687_s5 = sld [smem:[#allocation4 + $0x24]] }
  0x56   :  { %s689_s6 = sld [smem:[#allocation4 + $0x7]]  ;;  %v343_v51 = vstv %s679_s4 }
  0x57   :  { %s691_s2 = sld [smem:[#allocation4 + $0xf]]  ;;  %v365_v52 = vstv %s681_s28 }
  0x58   :  { %1107 = sst [smem:[#allocation30_spill]] %s677_s9 }
  0x59   :  { %1108 = sst [smem:[#allocation31_spill]] %s683_s29 }
  0x5a   :  { %1109 = sst [smem:[#allocation32_spill]] %s685_s30 }
  0x5b   :  { %1110 = sst [smem:[#allocation33_spill]] %s687_s5 }
  0x5c   :  { %s693_s7 = sld [smem:[#allocation4 + $0x16]]  ;;  %v322_v58 = vstv %s689_s6 }
  0x5d   :  { %1111 = sst [smem:[#allocation34_spill]] %s691_s2 }
  0x5e   :  { %s697_s9 = sld [smem:[#allocation3 + $0x8]] }
  0x5f   :  { %s701_s29 = sld [smem:[#allocation3 + $0x9]] }
  0x60   :  { %s703_s30 = sld [smem:[#allocation3 + $0xa]] }
  0x61   :  { %s705_s5 = sld [smem:[#allocation3 + $0xb]] }
  0x62   :  { %1112 = sst [smem:[#allocation35_spill]] %s693_s7 }
  0x63   :  { %s712_s7 = sld [smem:[#allocation3 + $0xc]] }
  0x64   :  { %1113 = sst [smem:[#allocation36_spill]] %s697_s9 }
  0x65   :  { %s714_s9 = sld [smem:[#allocation3 + $0xd]]  ;;  %v284_v63 = vstv %s701_s29 }
  0x66   :  { %1114 = sst [smem:[#allocation37_spill]] %s703_s30 }
  0x67   :  { %1115 = sst [smem:[#allocation38_spill]] %s705_s5 }
  0x68   :  { %s716_s2 = sld [smem:[#allocation4 + $0x8]] }
  0x69   :  { %1116 = sst [smem:[#allocation39_spill]] %s712_s7 }
  0x6a   :  { %s718_s30 = sld [smem:[#allocation4 + $0x10]] }
  0x6b   :  { %1117 = sst [smem:[#allocation40_spill]] %s714_s9 }
  0x6c   :  { %s721_s5 = sld [smem:[#allocation4 + $0x17]] }
  0x6d   :  { %s1122_s0 = sld [smem:[#allocation23_spill]] }
  0x6e   :  { %1118 = sst [smem:[#allocation41_spill]] %s716_s2 }
  0x6f   :  { %s728_s2 = sld [smem:[#allocation4 + $0x1c]] }
  0x70   :  { %1119 = sst [smem:[#allocation42_spill]] %s718_s30 }
  0x71   :  { %s1123_s12 = sld [smem:[#allocation24_spill]] }
  0x72   :  { %1120 = sst [smem:[#allocation43_spill]] %s721_s5 }
  0x73   :  { %s734_s5 = sld [smem:[#allocation4 + $0x1d]]  ;;  %v378_v39 = vstv %s1122_s0 }
  0x74   :  { %s1124_s13 = sld [smem:[#allocation25_spill]] }
  0x75   :  { %s741_s14 = sld [smem:[#allocation4 + $0x21]] }
  0x76   :  { %s1125_s15 = sld [smem:[#allocation26_spill]] }
  0x77   :  { %s1126_s10 = sld [smem:[#allocation27_spill]]  ;;  %v395_v40 = vstv %s1123_s12 }
  0x78   :  { %s1127_s16 = sld [smem:[#allocation28_spill]] }
  0x79   :  { %1121 = sst [smem:[#allocation44_spill]] %s734_s5 }
  0x7a   :  { %s747_s17 = sld [smem:[#allocation4 + $0x22]]  ;;  %v263_v41 = vstv %s1124_s13 }
  0x7b   :  { %s1128_s18 = sld [smem:[#allocation29_spill]] }
  0x7c   :  { %s753_s19 = sld [smem:[#allocation4 + $0x25]]  ;;  %v316_v43 = vstv %s1125_s15 }
  0x7d   :  { %s1129_s21 = sld [smem:[#allocation30_spill]]  ;;  %v340_v44 = vstv %s1126_s10 }
  0x7e   :  { %s1130_s23 = sld [smem:[#allocation31_spill]]  ;;  %v362_v45 = vstv %s1127_s16 }
  0x7f   :  { %s759_s22 = sld [smem:[#allocation4 + $0x26]] }
  0x80   :  { %s1132_s20 = sld [smem:[#allocation32_spill]] }
  0x81   :  { %s1133_s1 = sld [smem:[#allocation33_spill]]  ;;  %v381_v46 = vstv %s1128_s18 }
  0x82   :  { %s1134_s24 = sld [smem:[#allocation34_spill]] }
  0x83   :  { %s766_s27 = sld [smem:[#allocation4 + $0x27]]  ;;  %v319_v50 = vstv %s1129_s21 }
  0x84   :  { %s1136_s12 = sld [smem:[#allocation35_spill]]  ;;  %v384_v53 = vstv %s1130_s23 }
  0x85   :  { %1131 = sst [smem:[#allocation26_spill]] %s759_s22 }
  0x86   :  { %s1137_s0 = sld [smem:[#allocation36_spill]]  ;;  %v400_v54 = vstv %s1132_s20 }
  0x87   :  { %s1138_s26 = sld [smem:[#allocation37_spill]]  ;;  %v413_v55 = vstv %s1133_s1 }
  0x88   :  { %s772_s13 = sld [smem:[#allocation4 + $0x28]]  ;;  %v346_v59 = vstv %s1134_s24 }
  0x89   :  { %1135 = sst [smem:[#allocation28_spill]] %s766_s27 }
  0x8a   :  { %s778_s18 = sld [smem:[#allocation4 + $0x29]]  ;;  %v368_v61 = vstv %s1136_s12 }
  0x8b   :  { %s1141_s23 = sld [smem:[#allocation41_spill]] }
  0x8c   :  { %s792_s20 = sld [smem:[#allocation4 + $0x2b]]  ;;  %v281_v62 = vstv %s1137_s0 }
  0x8d   :  { %v695_v10 = vpop.permute.xlu0 %198  ;;  %v699_v11 = vpop.permute.xlu1 %203  ;;  %s1142_s1 = sld [smem:[#allocation43_spill]]  ;;  %v287_v0 = vstv %s1138_s26 }
  0x8e   :  { %s1172_s29 = sld [smem:[#allocation38_spill]] }
  0x8f   :  { %s1174_s6 = sld [smem:[#allocation39_spill]] }
  0x90   :  { %1140 = sst [smem:[#allocation30_spill]] %s778_s18 }
  0x91   :  { %v707_v12 = vpop.permute.xlu0 %208  ;;  %v325_v9 = vstv %s1141_s23  ;;  %s997_s3 = sld [smem:[#allocation4 + $0x2c]] }
  0x92   :  { %s1177_s8 = sld [smem:[#allocation30_spill]] }
  0x93   :  { %s1186_s9 = sld [smem:[#allocation45_spill]] }
  0x94   :  { %v206_v14 = vpop.permute.xlu1 %205 }
  0x95   :  { %v201_v15 = vpop.permute.xlu0 %200  ;;  %v783_v56 = vsel %vm111_vm1, %v699_v11, %v206_v14  ;;  %v349_v11 = vstv %s718_s30  ;;  %v371_v14 = vstv %s1142_s1  ;;  %s973_s30 = sld [smem:[#allocation4 + $0x2a]] }
  0x96   :  { %v788_v57 = vsel %vm111_vm1, %v695_v10, %v201_v15  ;;  %v305_v6 = vmul.f32 %v304_v17, %v783_v56  ;;  %v387_v15 = vstv %s728_s2  ;;  %s1176_s2 = sld [smem:[#allocation28_spill]] }
  0x97   :  { %v303_v7 = vmul.f32 %v302_v21, %v788_v57  ;;  %v403_v21 = vstv %s741_s14 }
  0x98   :  { %v211_v26 = vpop.permute.xlu1 %210 }
  0x99   :  { %v214_v32 = vpop.permute.xlu0 %213  ;;  %v811_v10 = vsel %vm112_vm3, %v707_v12, %v211_v26  ;;  %v416_v26 = vstv %s753_s19  ;;  %s1173_s19 = sld [smem:[#allocation26_spill]] }
  0x9a   :  { %v332_v4 = vmul.f32 %v331_v24, %v811_v10  ;;  %v267_v24 = vmul.f32 %v266_v20, %v788_v57 }
  0x9c   :  { %v216_v42 = vpop.permute.xlu1 %215 }
  0x9d   :  { %v189_v47 = vpop.permute.xlu0 %188 }
  0xa0   :  { %v191_v60 = vpop.permute.xlu1 %190 }
  0xa1   :  { %v192_v1 = vsel %vm110_vm2, %v189_v47, %v191_v60  ;;  %v219_v2 = vpop.permute.xlu0 %218  ;;  %v390_v47 = vstv %s734_s5  ;;  %v821_v60 = vsel %vm112_vm3, %v214_v32, %v216_v42  ;;  %v270_v42 = vmul.f32 %v269_v16, %v783_v56  ;;  %s981_s5 = sld [smem:[#allocation3 + $0xe]] }
  0xa2   :  { %v261_v8 = vmul.f32 %v260_v34, %v192_v1  ;;  %v406_v34 = vstv %s747_s17  ;;  %v311_v16 = vmul.f32 %v310_v28, %v821_v60  ;;  %s1180_s17 = sld [smem:[#allocation40_spill]] }
  0xa4   :  { %v262_v19 = vadd.f32 %v261_v8, %v259_v33  ;;  %v221_v17 = vpop.permute.xlu1 %220  ;;  %v306_v33 = vadd.f32 %v305_v6, %v303_v7  ;;  %v308_v8 = vmul.f32 %v307_v23, %v811_v10  ;;  %v330_v23 = vmul.f32 %v329_v18, %v783_v56 }
  0xa5   :  { %v194_v12 = vpop.permute.xlu0 %193  ;;  %v839_v1 = vsel %vm113_vm4, %v219_v2, %v221_v17  ;;  %v335_v2 = vmul.f32 %v334_v29, %v821_v60  ;;  %v273_v7 = vmul.f32 %v272_v22, %v811_v10  ;;  %v355_v6 = vmul.f32 %v354_v25, %v811_v10 }
  0xa6   :  { %v357_v18 = vmul.f32 %v356_v30, %v821_v60  ;;  %v309_v28 = vadd.f32 %v308_v8, %v306_v33  ;;  %v333_v5 = vadd.f32 %v332_v4, %v330_v23  ;;  %v314_v29 = vmul.f32 %v313_v36, %v839_v1 }
  0xa7   :  { %v276_v22 = vmul.f32 %v275_v27, %v821_v60  ;;  %v377_v25 = vmul.f32 %v376_v31, %v821_v60  ;;  %v338_v30 = vmul.f32 %v337_v37, %v839_v1  ;;  %v379_v36 = vmul.f32 %v378_v39, %v839_v1 }
  0xa8   :  { %v196_v17 = vpop.permute.xlu1 %195  ;;  %v312_v4 = vadd.f32 %v311_v16, %v309_v28  ;;  %v336_v33 = vadd.f32 %v335_v2, %v333_v5  ;;  %v358_v8 = vadd.f32 %v357_v18, %v355_v6  ;;  %v279_v31 = vmul.f32 %v278_v35, %v839_v1 }
  0xa9   :  { %v197_v20 = vsel %vm110_vm2, %v194_v12, %v196_v17  ;;  %v224_v32 = vpop.permute.xlu0 %223  ;;  %v360_v12 = vmul.f32 %v359_v38, %v839_v1  ;;  %v396_v37 = vmul.f32 %v395_v40, %v839_v1  ;;  %v380_v6 = vadd.f32 %v379_v36, %v377_v25 }
  0xaa   :  { %v264_v3 = vmul.f32 %v263_v41, %v197_v20  ;;  %v315_v23 = vadd.f32 %v314_v29, %v312_v4  ;;  %v339_v35 = vadd.f32 %v338_v30, %v336_v33 }
  0xab   :  { %v361_v40 = vadd.f32 %v360_v12, %v358_v8 }
  0xac   :  { %v265_v41 = vadd.f32 %v264_v3, %v262_v19  ;;  %v226_v27 = vpop.permute.xlu1 %225 }
  0xad   :  { %v894_v38 = vsel %vm113_vm4, %v224_v32, %v226_v27  ;;  %v229_v5 = vpop.permute.xlu0 %228 }
  0xae   :  { %v268_v16 = vadd.f32 %v267_v24, %v265_v41  ;;  %v317_v39 = vmul.f32 %v316_v43, %v894_v38  ;;  %v341_v3 = vmul.f32 %v340_v44, %v894_v38  ;;  %v363_v19 = vmul.f32 %v362_v45, %v894_v38 }
  0xaf   :  { %v382_v32 = vmul.f32 %v381_v46, %v894_v38  ;;  %v398_v44 = vmul.f32 %v397_v48, %v894_v38  ;;  %v412_v24 = vmul.f32 %v411_v49, %v894_v38 }
  0xb0   :  { %v271_v43 = vadd.f32 %v270_v42, %v268_v16  ;;  %v231_v2 = vpop.permute.xlu1 %230  ;;  %v318_v17 = vadd.f32 %v317_v39, %v315_v23  ;;  %v342_v18 = vadd.f32 %v341_v3, %v339_v35  ;;  %v282_v42 = vmul.f32 %v281_v62, %v894_v38 }
  0xb1   :  { %v917_v45 = vsel %vm114_vm5, %v229_v5, %v231_v2  ;;  %v234_v46 = vpop.permute.xlu0 %233  ;;  %v364_v29 = vadd.f32 %v363_v19, %v361_v40  ;;  %v383_v25 = vadd.f32 %v382_v32, %v380_v6  ;;  %v399_v12 = vadd.f32 %v398_v44, %v396_v37 }
  0xb2   :  { %v274_v20 = vadd.f32 %v273_v7, %v271_v43  ;;  %v320_v48 = vmul.f32 %v319_v50, %v917_v45  ;;  %v344_v49 = vmul.f32 %v343_v51, %v917_v45  ;;  %v366_v28 = vmul.f32 %v365_v52, %v917_v45 }
  0xb3   :  { %v385_v30 = vmul.f32 %v384_v53, %v917_v45  ;;  %v401_v62 = vmul.f32 %v400_v54, %v917_v45  ;;  %v414_v50 = vmul.f32 %v413_v55, %v917_v45  ;;  %v285_v52 = vmul.f32 %v284_v63, %v917_v45 }
  0xb4   :  { %v277_v7 = vadd.f32 %v276_v22, %v274_v20  ;;  %v236_v51 = vpop.permute.xlu1 %235  ;;  %v321_v4 = vadd.f32 %v320_v48, %v318_v17  ;;  %v345_v33 = vadd.f32 %v344_v49, %v342_v18  ;;  %v367_v36 = vadd.f32 %v366_v28, %v364_v29 }
  0xb5   :  { %v945_v53 = vsel %vm114_vm5, %v234_v46, %v236_v51  ;;  %v239_v54 = vpop.permute.xlu0 %238  ;;  %v386_v27 = vadd.f32 %v385_v30, %v383_v25  ;;  %v402_v8 = vadd.f32 %v401_v62, %v399_v12  ;;  %v1179_v48 = vstv %s1174_s6 }
  0xb6   :  { %v323_v22 = vmul.f32 %v322_v58, %v945_v53  ;;  %v347_v55 = vmul.f32 %v346_v59, %v945_v53  ;;  %v369_v41 = vmul.f32 %v368_v61, %v945_v53  ;;  %v280_v63 = vadd.f32 %v279_v31, %v277_v7 }
  0xb7   :  { %v388_v37 = vmul.f32 %v387_v15, %v945_v53  ;;  %v404_v5 = vmul.f32 %v403_v21, %v945_v53  ;;  %v288_v59 = vmul.f32 %v287_v0, %v945_v53  ;;  %v415_v61 = vadd.f32 %v414_v50, %v412_v24 }
  0xb8   :  { %v241_v58 = vpop.permute.xlu1 %240  ;;  %v283_v23 = vadd.f32 %v282_v42, %v280_v63  ;;  %v417_v31 = vmul.f32 %v416_v26, %v945_v53  ;;  %v324_v21 = vadd.f32 %v323_v22, %v321_v4  ;;  %v348_v39 = vadd.f32 %v347_v55, %v345_v33 }
  0xb9   :  { %v971_v16 = vsel %vm115_vm6, %v239_v54, %v241_v58  ;;  %v244_v15 = vpop.permute.xlu0 %243  ;;  %v370_v3 = vadd.f32 %v369_v41, %v367_v36  ;;  %v389_v19 = vadd.f32 %v388_v37, %v386_v27  ;;  %v405_v6 = vadd.f32 %v404_v5, %v402_v8 }
  0xba   :  { %v286_v35 = vadd.f32 %v285_v52, %v283_v23  ;;  %v326_v0 = vmul.f32 %v325_v9, %v971_v16  ;;  %v350_v40 = vmul.f32 %v349_v11, %v971_v16  ;;  %v372_v26 = vmul.f32 %v371_v14, %v971_v16 }
  0xbb   :  { %v391_v32 = vmul.f32 %v390_v47, %v971_v16  ;;  %v407_v43 = vmul.f32 %v406_v34, %v971_v16  ;;  %v1175_v24 = vstv %s1172_s29  ;;  %v1178_v34 = vstv %s1173_s19 }
  0xbc   :  { %v246_v44 = vpop.permute.xlu1 %245  ;;  %v289_v9 = vadd.f32 %v288_v59, %v286_v35  ;;  %v291_v11 = vmul.f32 %v1175_v24, %v971_v16  ;;  %v327_v2 = vadd.f32 %v326_v0, %v324_v21  ;;  %v351_v17 = vadd.f32 %v350_v40, %v348_v39 }
  0xbd   :  { %v247_v18 = vsel %vm115_vm6, %v244_v15, %v246_v44  ;;  %v249_v14 = vpop.permute.xlu0 %248  ;;  %v373_v47 = vadd.f32 %v372_v26, %v370_v3  ;;  %v392_v46 = vadd.f32 %v391_v32, %v389_v19  ;;  %v420_v42 = vmul.f32 %v1178_v34, %v971_v16 }
  0xbe   :  { %v292_v20 = vadd.f32 %v291_v11, %v289_v9  ;;  %v294_v49 = vmul.f32 %v1179_v48, %v247_v18  ;;  %v328_v28 = vmul.f32 %v327_v2, %v788_v57  ;;  %v352_v29 = vmul.f32 %v351_v17, %v783_v56 }
  0xbf   :  { %v374_v25 = vmul.f32 %v373_v47, %v811_v10  ;;  %v408_v30 = vadd.f32 %v407_v43, %v405_v6  ;;  %v418_v62 = vadd.f32 %v417_v31, %v415_v61  ;;  %v1181_v7 = vstv %s1176_s2 }
  0xc0   :  { %v425_v12 = vmul.f32 %v1181_v7, %v917_v45  ;;  %v295_v50 = vadd.f32 %v294_v49, %v292_v20  ;;  %v251_v51 = vpop.permute.xlu1 %250  ;;  %v353_v52 = vadd.f32 %v352_v29, %v328_v28  ;;  %v1182_v4 = vstv %s772_s13 }
  0xc1   :  { %v427_v33 = vmul.f32 %v1182_v4, %v945_v53  ;;  %v1183_v36 = vstv %s1177_s8  ;;  %v252_v56 = vsel %vm116_vm7, %v249_v14, %v251_v51  ;;  %v393_v10 = vmul.f32 %v392_v46, %v821_v60  ;;  %v254_v5 = vpop.permute.xlu0 %253 }
  0xc2   :  { %v430_v57 = vmul.f32 %v1183_v36, %v971_v16  ;;  %v421_v54 = vadd.f32 %v420_v42, %v418_v62  ;;  %v434_v22 = vstv %s973_s30  ;;  %v1184_v55 = vstv %s1180_s17 }
  0xc3   :  { %v297_v41 = vmul.f32 %v1184_v55, %v252_v56  ;;  %v375_v63 = vadd.f32 %v374_v25, %v353_v52  ;;  %v428_v27 = vadd.f32 %v427_v33, %v425_v12  ;;  %v1185_v8 = vstv %s792_s20 }
  0xc4   :  { %v437_v37 = vmul.f32 %v1185_v8, %v971_v16  ;;  %v299_v58 = vstv %s981_s5  ;;  %v409_v23 = vmul.f32 %v408_v30, %v839_v1  ;;  %v256_v61 = vpop.permute.xlu1 %255  ;;  %v435_v21 = vmul.f32 %v434_v22, %v945_v53 }
  0xc5   :  { %v298_v59 = vadd.f32 %v297_v41, %v295_v50  ;;  %v394_v31 = vadd.f32 %v393_v10, %v375_v63  ;;  %v431_v15 = vadd.f32 %v430_v57, %v428_v27  ;;  %v441_v60 = vstv %s997_s3 }
  0xc6   :  { %v257_v39 = vsel %vm116_vm7, %v254_v5, %v256_v61  ;;  %v422_v35 = vmul.f32 %v421_v54, %v894_v38  ;;  %v438_v0 = vadd.f32 %v437_v37, %v435_v21  ;;  %v442_v1 = vmul.f32 %v441_v60, %v971_v16 }
  0xc7   :  { %v410_v3 = vadd.f32 %v409_v23, %v394_v31  ;;  %v300_v40 = vmul.f32 %v299_v58, %v257_v39  ;;  %v432_v26 = vmul.f32 %v431_v15, %v917_v45 }
  0xc8   :  { %v439_v43 = vmul.f32 %v438_v0, %v945_v53  ;;  %v443_v9 = vmul.f32 %v442_v1, %v971_v16 }
  0xc9   :  { %v423_v19 = vadd.f32 %v422_v35, %v410_v3  ;;  %v301_v32 = vadd.f32 %v300_v40, %v298_v59 }
  0xcb   :  { %v433_v6 = vadd.f32 %v432_v26, %v423_v19 }
  0xcd   :  { %v440_v44 = vadd.f32 %v439_v43, %v433_v6 }
  0xcf   :  { %v444_v24 = vadd.f32 %v443_v9, %v440_v44 }
  0xd1   :  { %v445_v13 = vadd.f32 %v444_v24, %v301_v32 }
  0xd3   :  { %446 = vst [vmem:[%s1186_s9] sm:$0xff] %v445_v13 }

</bundles_post_ra>
